<compile_context>
chip_gen: v5e
topology: v5e:2x2
jax: 0.10.0
libtpu: 0.0.40
codegen_flags: <defaults>
</compile_context>

<pallas_src>
import jax
import jax.numpy as jnp
import numpy as np
from jax import lax
from jax.experimental import pallas as pl
from jax.experimental.pallas import tpu as pltpu


def _round_up(v, m):
    return ((v + m - 1) // m) * m


def _make_resblock_kernel(hidden_p, tile_n):
    resident = (tile_n == hidden_p)

    def kernel(x_ref, w_ref, b_ref, o_ref):
        # x_ref: [TILE_R, Hp]      row tile (full contraction dim)
        # w_ref: [TILE_N, Hp]      weight tile, PyTorch [out, in] layout
        # b_ref: [1, TILE_N]       bias tile
        # o_ref: [TILE_R, TILE_N]  output tile
        x = x_ref[...]
        # y = x @ W_tile^T + b : contract x dim 1 with W dim 1 ("in"); f32 acc.
        y = lax.dot_general(
            x, w_ref[...],
            dimension_numbers=(((1,), (1,)), ((), ())),
            preferred_element_type=jnp.float32,
        ) + b_ref[...].astype(jnp.float32)
        silu = y * jax.nn.sigmoid(y)          # exp on EUP, mul/add on VPU
        if resident:
            x_res = x.astype(jnp.float32)
        else:
            j = pl.program_id(1)
            off = pl.multiple_of(j * tile_n, 128)
            x_res = x_ref[:, pl.ds(off, tile_n)].astype(jnp.float32)
        # Residual add kept in f32 even if inputs/outputs are bf16.
        o_ref[...] = (x_res + silu).astype(o_ref.dtype)

    return kernel


def _choose_tiles(rows, hidden_p, x_item, w_item, *, tile_r_max, budget):
    """Pick (tile_r, tile_n) so double-buffered tiles fit the VMEM budget."""
    tile_r = min(tile_r_max, _round_up(rows, 8))

    def need(tr, tn):
        return (2 * tr * hidden_p * x_item      # x tiles (double-buffered)
                + 2 * tn * hidden_p * w_item    # weight tiles
                + 2 * tn * w_item               # bias tiles
                + 2 * tr * tn * x_item)         # output tiles

    # Candidate column tiles: 128-multiple divisors of hidden_p, largest first.
    cands = [tn for tn in range(hidden_p, 0, -128) if hidden_p % tn == 0]
    tile_n = cands[-1]
    for tn in cands:
        if need(tile_r, tn) <= budget:
            tile_n = tn
            break
    # If even the smallest column tile is too big, shrink the row tile.
    while need(tile_r, tile_n) > budget and tile_r > 8:
        tile_r = max(8, ((tile_r // 2) // 8) * 8)
    return tile_r, tile_n, need(tile_r, tile_n)


def resblock_forward(x, weight, bias, *, tile_r_max=512, vmem_budget_bytes=40 << 20):
    """ResBlock forward: x + SiLU(x @ W^T + b).

    x: [..., H]; weight: [H, H] (PyTorch nn.Linear layout [out, in]); bias: [H].
    """
    orig_shape = x.shape
    hidden = orig_shape[-1]
    x2d = x.reshape(-1, hidden)
    rows = x2d.shape[0]

    # Lane-dense layout: pad hidden to a multiple of 128 (unmasked vst's).
    hidden_p = _round_up(hidden, 128)

    x_item = jnp.dtype(x.dtype).itemsize
    w_item = jnp.dtype(weight.dtype).itemsize
    tile_r, tile_n, needed = _choose_tiles(
        rows, hidden_p, x_item, w_item,
        tile_r_max=tile_r_max, budget=vmem_budget_bytes)
    rows_p = _round_up(rows, tile_r)

    if hidden_p != hidden:
        x2d = jnp.pad(x2d, ((0, 0), (0, hidden_p - hidden)))
        weight = jnp.pad(weight, ((0, hidden_p - hidden), (0, hidden_p - hidden)))
        bias = jnp.pad(bias, (0, hidden_p - hidden))
    if rows_p != rows:
        x2d = jnp.pad(x2d, ((0, rows_p - rows), (0, 0)))

    b2d = bias.reshape(1, hidden_p)
    grid_r = rows_p // tile_r
    grid_n = hidden_p // tile_n

    # Scoped VMEM: enough for the chosen tiles, capped under v7x's 64 MiB.
    vmem_limit = int(min(max(2 * needed, 32 << 20), 64 << 20))

    kernel = _make_resblock_kernel(hidden_p, tile_n)

    out = pl.pallas_call(
        kernel,
        out_shape=jax.ShapeDtypeStruct((rows_p, hidden_p), x.dtype),
        grid=(grid_r, grid_n),
        in_specs=[
            # Row tile: constant across the column axis -> fetched once per i.
            pl.BlockSpec((tile_r, hidden_p), lambda i, j: (i, 0)),
            # Weight tile: resident when grid_n == 1, streamed otherwise.
            pl.BlockSpec((tile_n, hidden_p), lambda i, j: (j, 0)),
            pl.BlockSpec((1, tile_n), lambda i, j: (0, j)),
        ],
        out_specs=pl.BlockSpec((tile_r, tile_n), lambda i, j: (i, j)),
        compiler_params=pltpu.CompilerParams(
            dimension_semantics=("parallel", "parallel"),  # v7x: 2 TCs share grid
            vmem_limit_bytes=vmem_limit,
        ),
    )(x2d, weight, b2d)

    out = out[:rows, :hidden]
    return out.reshape(orig_shape)


def _numpy_ref(x, w, b):
    x64 = np.asarray(x, dtype=np.float64)
    w64 = np.asarray(w, dtype=np.float64)
    b64 = np.asarray(b, dtype=np.float64)
    y64 = x64 @ w64.T + b64
    return x64 + y64 * (1.0 / (1.0 + np.exp(-y64)))


if __name__ == "__main__":
    key = jax.random.PRNGKey(0)
    batch, seq, hidden = 2, 8, 32

    k_x, k_b, k_w, k_x2, k_b2, k_w2 = jax.random.split(key, 6)
    x = jax.random.normal(k_x, (batch, seq, hidden), dtype=jnp.float32)

    bound = 1.0 / np.sqrt(hidden)
    bias = jax.random.uniform(k_b, (hidden,), minval=-bound, maxval=bound,
                              dtype=jnp.float32)

    # 1) Module default: zero-initialized weight (exact path, no matmul).
    w_zero = jnp.zeros((hidden, hidden), dtype=jnp.float32)
    out0 = resblock_forward(x, w_zero, bias)
    jax.block_until_ready(out0)
    y0 = jnp.broadcast_to(bias, x.shape)
    ref0 = x + y0 * jax.nn.sigmoid(y0)
    assert jnp.allclose(out0, ref0, atol=1e-5, rtol=1e-5)

    # 2) Random weight: exercises the MXU matmul (resident-weight fast path).
    w_rand = 0.1 * jax.random.normal(k_w, (hidden, hidden), dtype=jnp.float32)
    out1 = resblock_forward(x, w_rand, bias)
    jax.block_until_ready(out1)
    ref1 = _numpy_ref(x, w_rand, bias)
    assert np.allclose(np.asarray(out1, dtype=np.float64), ref1,
                       atol=2e-2, rtol=2e-2)

    # 3) Larger, non-128-multiple hidden with a tiny VMEM budget: forces the
    #    streamed column-tiled weight path (grid_n > 1) plus hidden padding.
    hidden2 = 200
    x2 = jax.random.normal(k_x2, (batch, seq, hidden2), dtype=jnp.float32)
    bound2 = 1.0 / np.sqrt(hidden2)
    bias2 = jax.random.uniform(k_b2, (hidden2,), minval=-bound2, maxval=bound2,
                               dtype=jnp.float32)
    w2 = 0.1 * jax.random.normal(k_w2, (hidden2, hidden2), dtype=jnp.float32)
    out2 = resblock_forward(x2, w2, bias2, vmem_budget_bytes=400_000)
    jax.block_until_ready(out2)
    ref2 = _numpy_ref(x2, w2, bias2)
    assert np.allclose(np.asarray(out2, dtype=np.float64), ref2,
                       atol=2e-2, rtol=2e-2)

    print("KERNEL_OK")
</pallas_src>

<mosaic_0001>
module attributes {stable_mosaic.version = 11 : i64} {
  func.func @kernel(%arg0: i32, %arg1: i32, %arg2: memref<16x128xf32, #tpu.memory_space<vmem>>, %arg3: memref<128x128xf32, #tpu.memory_space<vmem>>, %arg4: memref<1x128xf32, #tpu.memory_space<vmem>>, %arg5: memref<16x128xf32, #tpu.memory_space<vmem>>) attributes {dimension_semantics = [#tpu.dimension_semantics<parallel>, #tpu.dimension_semantics<parallel>], iteration_bounds = array<i64: 1, 1>, scalar_prefetch = 0 : i64, scratch_operands = 0 : i64, tpu.core_type = #tpu.core_type<tc>, window_params = [{transform_indices = @transform_0, window_bounds = array<i64: 16, 128>}, {transform_indices = @transform_1, window_bounds = array<i64: 128, 128>}, {transform_indices = @transform_2, window_bounds = array<i64: 1, 128>}, {transform_indices = @transform_3, window_bounds = array<i64: 16, 128>}]} {
    %c0 = arith.constant 0 : index
    %c0_0 = arith.constant 0 : index
    %0 = vector.load %arg2[%c0, %c0_0] : memref<16x128xf32, #tpu.memory_space<vmem>>, vector<16x128xf32>
    %c0_1 = arith.constant 0 : index
    %c0_2 = arith.constant 0 : index
    %1 = vector.load %arg3[%c0_1, %c0_2] : memref<128x128xf32, #tpu.memory_space<vmem>>, vector<128x128xf32>
    %cst = arith.constant dense<0.000000e+00> : vector<16x128xf32>
    %2 = tpu.matmul %0, %1, %cst {dimension_numbers = #tpu.dot_dimension_numbers<[1], [1], [0], [0], [0, 0, 1, 0], [], []>} : vector<16x128xf32>, vector<128x128xf32>, vector<16x128xf32> -> vector<16x128xf32>
    %c0_3 = arith.constant 0 : index
    %c0_4 = arith.constant 0 : index
    %3 = vector.load %arg4[%c0_3, %c0_4] : memref<1x128xf32, #tpu.memory_space<vmem>>, vector<1x128xf32>
    %4 = vector.broadcast %3 : vector<1x128xf32> to vector<16x128xf32>
    %5 = arith.addf %2, %4 : vector<16x128xf32>
    %6 = arith.negf %5 : vector<16x128xf32>
    %7 = math.exp %6 : vector<16x128xf32>
    %cst_5 = arith.constant 1.000000e+00 : f32
    %8 = vector.broadcast %cst_5 : f32 to vector<16x128xf32>
    %9 = arith.addf %8, %7 : vector<16x128xf32>
    %10 = arith.divf %8, %9 : vector<16x128xf32>
    %11 = arith.mulf %5, %10 : vector<16x128xf32>
    %12 = arith.addf %0, %11 : vector<16x128xf32>
    %c0_6 = arith.constant 0 : index
    %c0_7 = arith.constant 0 : index
    %13 = vector.load %arg5[%c0_6, %c0_7] : memref<16x128xf32, #tpu.memory_space<vmem>>, vector<16x128xf32>
    tpu.vector_store %arg5[%c0_6, %c0_7], %12 {strides = array<i32>} : memref<16x128xf32, #tpu.memory_space<vmem>>, vector<16x128xf32>,
    return
  }
  func.func @transform_0(%arg0: i32, %arg1: i32) -> (i32, i32) {
    %c0_i32 = arith.constant 0 : i32
    %c0_i32_0 = arith.constant 0 : i32
    return %arg0, %c0_i32 : i32, i32
  }
  func.func @transform_1(%arg0: i32, %arg1: i32) -> (i32, i32) {
    %c0_i32 = arith.constant 0 : i32
    %c0_i32_0 = arith.constant 0 : i32
    return %arg1, %c0_i32 : i32, i32
  }
  func.func @transform_2(%arg0: i32, %arg1: i32) -> (i32, i32) {
    %c0_i32 = arith.constant 0 : i32
    %c0_i32_0 = arith.constant 0 : i32
    return %c0_i32, %arg1 : i32, i32
  }
  func.func @transform_3(%arg0: i32, %arg1: i32) -> (i32, i32) {
    %c0_i32 = arith.constant 0 : i32
    return %arg0, %arg1 : i32, i32
  }
}

</mosaic_0001>

<bundles_post_ra>
// kernel: tpu_custom_call.1
= control target key start
LH: loop header
LB: loop body
LE: loop exit
PB: predicated region body
PF: predicated region fallthrough
CT: control target
= control target key end

     0   :  { %8 = vsyncpa [#allocation3], 0  ;;  %s312_s0 = inlined_call_operand.hbm [shape: f32[16,128], index: 0, kind: input, shape index: {}]   ;;  %s313_s1 = inlined_call_operand.hbm [shape: f32[128,128], index: 1, kind: input, shape index: {}]   ;;  %s314_s2 = inlined_call_operand.vmem [shape: f32[1,128], index: 2, kind: input, shape index: {}]   ;;  %s315_s3 = inlined_call_operand.hbm [shape: f32[16,128], index: 3, kind: output, shape index: {}]  }
   0x1   :  { %9 = vsyncpa [#allocation6], 0 }
   0x2   :  { %10 = vsyncpa [#allocation4], 0  ;;  %s15_s14 = sshll.u32 %s312_s0, 4  ;;  %s266_s15 = smov [#allocation2]   ;;  %s16_s14 = int_to_ptr.hbm [resolvable:$true] %s15_s14 }
   0x3   :  { %s17_s16 = sshll.u32 %s266_s15, 4  ;;  %s28_s19 = sshll.u32 %s313_s1, 4  ;;  %s18_s16 = int_to_ptr.vmem [resolvable:$true] %s17_s16  ;;  %s29_s19 = int_to_ptr.hbm [resolvable:$true] %s28_s19 }
   0x4   :  { %s267_s20 = smov 128   ;;  %s268_s21 = smov 8  }
   0x5   :  { %23 = dma.hbm_to_vmem [thread:$0]  %s16_s14, 256, %s18_s16, [#allocation3], %s267_s20, %s267_s20, %s268_s21  }
   0x6   :  { %s269_s22 = smov [#allocation5]  }
   0x7   :  { %s30_s23 = sshll.u32 %s269_s22, 4  ;;  %s31_s23 = int_to_ptr.vmem [resolvable:$true] %s30_s23 }
   0x8   :  { %36 = dma.hbm_to_vmem [thread:$0]  %s29_s19, 2048, %s31_s23, [#allocation6], %s267_s20, %s267_s20, %s268_s21  }
   0x9   :  { %260 = dma.done.wait [#allocation3], 256  }
   0xa   :  { %261 = vsyncadd [#allocation3], 4294967040 }
   0xb   :  { %262 = dma.done.wait [#allocation6], 2048  }
   0xc   :  { %263 = vsyncadd [#allocation6], 4294965248  ;;  %v64_v0 = vld [vmem:[#allocation5 + $0x78] sm:$0xff]  ;;  %v63_v1 = vld [vmem:[#allocation5 + $0x70] sm:$0xff]  ;;  %s142_s27 = sshll.u32 %s315_s3, 4  ;;  %s143_s27 = int_to_ptr.hbm [resolvable:$true] %s142_s27 }
   0xd   :  { %69 = vmatpush.xpose.msra.mxu0 %v64_v0  ;;  %158 = vmatpush.xpose.msra.mxu1 %v64_v0  ;;  %v62_v2 = vld [vmem:[#allocation5 + $0x68] sm:$0xff]  ;;  %v61_v3 = vld [vmem:[#allocation5 + $0x60] sm:$0xff]  ;;  %v60_v4 = vld [vmem:[#allocation5 + $0x58] sm:$0xff] }
   0xe   :  { %v59_v5 = vld [vmem:[#allocation5 + $0x50] sm:$0xff]  ;;  %v58_v6 = vld [vmem:[#allocation5 + $0x48] sm:$0xff]  ;;  %v57_v7 = vld [vmem:[#allocation5 + $0x40] sm:$0xff] }
   0xf   :  { %v56_v8 = vld [vmem:[#allocation5 + $0x38] sm:$0xff]  ;;  %v55_v9 = vld [vmem:[#allocation5 + $0x30] sm:$0xff]  ;;  %v54_v10 = vld [vmem:[#allocation5 + $0x28] sm:$0xff] }
  0x10   :  { %v53_v11 = vld [vmem:[#allocation5 + $0x20] sm:$0xff]  ;;  %v52_v12 = vld [vmem:[#allocation5 + $0x18] sm:$0xff]  ;;  %v51_v13 = vld [vmem:[#allocation5 + $0x10] sm:$0xff] }
  0x11   :  { %70 = vmatpush.xpose.msra.mxu0 %v63_v1  ;;  %159 = vmatpush.xpose.msra.mxu1 %v63_v1  ;;  %v50_v14 = vld [vmem:[#allocation5 + $0x8] sm:$0xff]  ;;  %v49_v15 = vld [vmem:[#allocation5] sm:$0xff]  ;;  %v47_v16 = vld [vmem:[#allocation2] sm:$0xff] }
  0x12   :  { %v48_v17 = vld [vmem:[#allocation2 + $0x8] sm:$0xff]  ;;  %v179_v18 = vld [vmem:[%s314_s2] ss:$0 sm:$0xff]  ;;  %s270_s2 = smov [#allocation7]  }
  0x13   :  { %s140_s24 = sshll.u32 %s270_s2, 4  ;;  %s141_s24 = int_to_ptr.vmem [resolvable:$true] %s140_s24 }
  0x15   :  { %71 = vmatpush.xpose.msra.mxu0 %v62_v2  ;;  %160 = vmatpush.xpose.msra.mxu1 %v62_v2 }
  0x19   :  { %72 = vmatpush.xpose.msra.mxu0 %v61_v3  ;;  %161 = vmatpush.xpose.msra.mxu1 %v61_v3 }
  0x1d   :  { %73 = vmatpush.xpose.msra.mxu0 %v60_v4  ;;  %162 = vmatpush.xpose.msra.mxu1 %v60_v4 }
  0x21   :  { %74 = vmatpush.xpose.msra.mxu0 %v59_v5  ;;  %163 = vmatpush.xpose.msra.mxu1 %v59_v5 }
  0x25   :  { %75 = vmatpush.xpose.msra.mxu0 %v58_v6  ;;  %164 = vmatpush.xpose.msra.mxu1 %v58_v6 }
  0x29   :  { %76 = vmatpush.xpose.msra.mxu0 %v57_v7  ;;  %165 = vmatpush.xpose.msra.mxu1 %v57_v7 }
  0x2d   :  { %77 = vmatpush.xpose.msra.mxu0 %v56_v8  ;;  %166 = vmatpush.xpose.msra.mxu1 %v56_v8 }
  0x31   :  { %78 = vmatpush.xpose.msra.mxu0 %v55_v9  ;;  %167 = vmatpush.xpose.msra.mxu1 %v55_v9 }
  0x35   :  { %79 = vmatpush.xpose.msra.mxu0 %v54_v10  ;;  %168 = vmatpush.xpose.msra.mxu1 %v54_v10 }
  0x39   :  { %80 = vmatpush.xpose.msra.mxu0 %v53_v11  ;;  %169 = vmatpush.xpose.msra.mxu1 %v53_v11 }
  0x3d   :  { %81 = vmatpush.xpose.msra.mxu0 %v52_v12  ;;  %170 = vmatpush.xpose.msra.mxu1 %v52_v12 }
  0x41   :  { %82 = vmatpush.xpose.msra.mxu0 %v51_v13  ;;  %171 = vmatpush.xpose.msra.mxu1 %v51_v13 }
  0x45   :  { %83 = vmatpush.xpose.msra.mxu0 %v50_v14  ;;  %172 = vmatpush.xpose.msra.mxu1 %v50_v14 }
  0x49   :  { %84 = vmatpush.xpose.msra.mxu0 %v49_v15  ;;  %173 = vmatpush.xpose.msra.mxu1 %v49_v15 }
  0x4c   :  { %85 = vmatmul.f32.vlgmr.msra.gmra.mxu0 %v47_v16  ;;  %88 = vmatmul.f32.vlgmr.msra.gmra.mxu1 %v48_v17 }
  0xc9   :  { %v86_v19 = vpop.f32.mrf.mxu0  ;;  %v89_v20 = vpop.f32.mrf.mxu1 }
  0xca   :  { %v87_v21 = vadd.f32 %v179_v18, %v86_v19  ;;  %v90_v22 = vadd.f32 %v179_v18, %v89_v20 }
  0xcc   :  { %v156_v23 = vmul.f32 -1.442695, %v87_v21  ;;  %v157_v24 = vmul.f32 -1.442695, %v90_v22 }
  0xce   :  { %180 = vpow2.f32 %v156_v23 }
  0xcf   :  { %182 = vpow2.f32 %v157_v24 }
  0xd4   :  { %v181_v25 = vpop.eup %180 }
  0xd5   :  { %v183_v26 = vpop.eup %182  ;;  %v98_v27 = vadd.f32 1.0, %v181_v25 }
  0xd6   :  { %v99_v28 = vadd.f32 1.0, %v183_v26 }
  0xd7   :  { %184 = vrcp.f32 %v98_v27  ;;  %v111_v34 = vand.u32 2147483648, %v98_v27  ;;  %v109_v37 = vand.u32 2147483647, %v98_v27  ;;  %vm105_vm2 = vweird.f32 %v98_v27 }
  0xd8   :  { %186 = vrcp.f32 %v99_v28  ;;  %v126_v38 = vand.u32 2147483648, %v99_v28  ;;  %v124_v40 = vand.u32 2147483647, %v99_v28  ;;  %vm120_vm4 = vweird.f32 %v99_v28 }
  0xd9   :  { %v112_v42 = vor.u32 1.1754944e-38, %v111_v34  ;;  %vm110_vm5 = vcmp.eq.f32.partialorder %v109_v37, 8.507059e+37 }
  0xda   :  { %v127_v45 = vor.u32 1.1754944e-38, %v126_v38  ;;  %vm125_vm7 = vcmp.eq.f32.partialorder %v124_v40, 8.507059e+37 }
  0xdd   :  { %v185_v29 = vpop.eup %184 }
  0xde   :  { %v187_v30 = vpop.eup %186  ;;  %v101_v31 = vmul.f32 %v185_v29, %v98_v27  ;;  %vm106_vm0 = vweird.f32 %v185_v29 }
  0xdf   :  { %v116_v32 = vmul.f32 %v187_v30, %v99_v28  ;;  %vm121_vm1 = vweird.f32 %v187_v30  ;;  %vm107_vm3 = vmor %vm105_vm2, %vm106_vm0 }
  0xe0   :  { %v102_v33 = vsub.f32 1.0, %v101_v31  ;;  %vm122_vm6 = vmor %vm120_vm4, %vm121_vm1 }
  0xe1   :  { %v117_v35 = vsub.f32 1.0, %v116_v32 }
  0xe2   :  { %v103_v36 = vmul.f32 %v185_v29, %v102_v33 }
  0xe3   :  { %v118_v39 = vmul.f32 %v187_v30, %v117_v35 }
  0xe4   :  { %v104_v41 = vadd.f32 %v185_v29, %v103_v36 }
  0xe5   :  { %v119_v43 = vadd.f32 %v187_v30, %v118_v39 }
  0xe6   :  { %v108_v44 = vsel %vm107_vm3, %v185_v29, %v104_v41 }
  0xe7   :  { %v113_v46 = vsel %vm110_vm5, %v112_v42, %v108_v44  ;;  %v123_v47 = vsel %vm122_vm6, %v187_v30, %v119_v43 }
  0xe8   :  { %v130_v48 = vmul.f32 %v113_v46, %v87_v21  ;;  %v128_v49 = vsel %vm125_vm7, %v127_v45, %v123_v47 }
  0xe9   :  { %v131_v50 = vmul.f32 %v128_v49, %v90_v22 }
  0xea   :  { %v132_v51 = vadd.f32 %v130_v48, %v47_v16 }
  0xeb   :  { %v133_v52 = vadd.f32 %v131_v50, %v48_v17 }
  0xec   :  { %134 = vst [vmem:[#allocation7] sm:$0xff] %v132_v51 }
  0xed   :  { %135 = vst [vmem:[#allocation7 + $0x8] sm:$0xff] %v133_v52 }
  0xee   :  { %148 = dma.vmem_to_hbm [thread:$0]  %s141_s24, 256, %s143_s27, [#allocation4], %s267_s20, %s267_s20, %s268_s21  }
  0xef   :  { %264 = dma.done.wait [#allocation4], 256  }
  0xf0   :  { %265 = vsyncadd [#allocation4], 4294967040 }
  0xf1   :  { %153 = vsyncpa [#allocation3], 1 }
  0xf2   :  { %154 = vsyncpa [#allocation6], 1 }
  0xf3   :  { %155 = vsyncpa [#allocation4], 1 }

</bundles_post_ra>
